<compile_context>
chip_gen: v7x
topology: tpu7x:2x2x1
jax: 0.10.0
libtpu: 0.0.40
codegen_flags: <defaults>
</compile_context>

<pallas_src>
import jax
import jax.numpy as jnp
from jax.experimental import pallas as pl
from jax.experimental.pallas import tpu as pltpu

INPUT_SIZE = 840
HL_SIZE = 256


def _round_up(x, m):
    return ((x + m - 1) // m) * m


def reward_mlp_kernel(x_ref, w1_ref, b1_ref, w2_ref, b2_ref, o_ref):
    # x_ref:  (TB, K)   f32   (batch tile; bf16 cast happens here, not in wrapper)
    # w1_ref: (K, HL)   bf16  (resident across the grid)
    # b1_ref: (1, HL)   f32
    # w2_ref: (1, HL)   f32   (second-layer weights as a lane row)
    # b2_ref: (1, 1)    f32   (SMEM scalar)
    # o_ref:  (1, TB)   f32   (lane-dense output row)
    x = x_ref[...].astype(jnp.bfloat16)
    h = jnp.dot(x, w1_ref[...], preferred_element_type=jnp.float32)
    h = jnp.maximum(h + b1_ref[...], 0.0)                  # ReLU, f32
    r = jnp.sum(h * w2_ref[...], axis=-1)                  # VPU mul + lane reduce -> (TB,)
    o_ref[...] = (r + b2_ref[0, 0]).reshape(1, -1)         # lane-dense store


def prepare_params(w1, b1, w2, b2):
    """One-time weight preparation (hoisted out of the per-call wrapper)."""
    in_sz, hl = w1.shape
    assert w2.shape == (hl, 1)
    return (
        w1.astype(jnp.bfloat16),                 # (in_sz, HL) bf16 MXU operand
        b1.reshape(1, hl).astype(jnp.float32),   # (1, HL)
        w2.reshape(1, hl).astype(jnp.float32),   # (1, HL) lane row
        b2.reshape(1, 1).astype(jnp.float32),    # (1, 1) SMEM scalar
    )


def _pick_tb(batch, tb_max):
    """Batch-tile selection.

    - batch <= 128: a single tile whose block dims equal the array dims
      (always layout-legal, grid = 1).
    - batch  > 128: 128-aligned tile, capped at tb_max, and never larger than
      ceil(batch/2) rounded up so there are >= 2 grid steps (both v7x
      TensorCores get work under the 'parallel' semantics).
    """
    if batch <= 128:
        return batch
    half = _round_up(-(-batch // 2), 128)
    return min(_round_up(tb_max, 128), half)


def reward_approximator_forward(state, params, *, tb=1024):
    """Pallas implementation of RewardApprocimator.forward.

    state:  (B, input_size) float32
    params: output of prepare_params(w1, b1, w2, b2)
    returns (B, 1) float32
    """
    w1_bf16, b1_row, w2_row, b2_2d = params
    in_sz, hl = w1_bf16.shape
    B, in_sz_x = state.shape
    assert in_sz_x == in_sz

    tb_eff = _pick_tb(B, tb)
    grid = (pl.cdiv(B, tb_eff),)   # partial last tile: reads clipped, stores masked

    out_row = pl.pallas_call(
        reward_mlp_kernel,
        out_shape=jax.ShapeDtypeStruct((1, B), jnp.float32),
        grid_spec=pltpu.PrefetchScalarGridSpec(
            num_scalar_prefetch=0,
            grid=grid,
            in_specs=[
                pl.BlockSpec((tb_eff, in_sz), lambda i: (i, 0)),     # x tile, full K (840 == array dim)
                pl.BlockSpec((in_sz, hl), lambda i: (0, 0)),         # W1 (resident)
                pl.BlockSpec((1, hl), lambda i: (0, 0)),             # b1
                pl.BlockSpec((1, hl), lambda i: (0, 0)),             # w2 lane row
                pl.BlockSpec(memory_space=pltpu.MemorySpace.SMEM),   # b2 scalar
            ],
            out_specs=pl.BlockSpec((1, tb_eff), lambda i: (0, i)),   # lane-dense output row
        ),
        compiler_params=pltpu.CompilerParams(
            dimension_semantics=("parallel",),
        ),
    )(state.astype(jnp.float32), w1_bf16, b1_row, w2_row, b2_2d)

    return out_row.reshape(B, 1)


def init_params(key, input_size=INPUT_SIZE, hl_size=HL_SIZE):
    """Deterministic init matching nn.Linear's U(-1/sqrt(fan_in), 1/sqrt(fan_in))."""
    k1, k2, k3, k4 = jax.random.split(key, 4)
    bound1 = 1.0 / jnp.sqrt(input_size)
    bound2 = 1.0 / jnp.sqrt(hl_size)
    w1 = jax.random.uniform(k1, (input_size, hl_size), jnp.float32, -bound1, bound1)
    b1 = jax.random.uniform(k2, (hl_size,), jnp.float32, -bound1, bound1)
    w2 = jax.random.uniform(k3, (hl_size, 1), jnp.float32, -bound2, bound2)
    b2 = jax.random.uniform(k4, (1,), jnp.float32, -bound2, bound2)
    return w1, b1, w2, b2


def _reference(state, w1, b1, w2, b2):
    return jnp.maximum(state @ w1 + b1, 0.0) @ w2 + b2


# TODO(synk): set_optimizer / set_trainable / reward-buffer bookkeeping are
# host-side training plumbing with no kernel equivalent; only forward is ported.

if __name__ == "__main__":
    key = jax.random.PRNGKey(0)
    kx, kx2, kp = jax.random.split(key, 3)
    w1, b1, w2, b2 = init_params(kp)
    params = prepare_params(w1, b1, w2, b2)   # one-time weight prep

    # Case 1: small batch -> single tile whose block dims equal the array dims.
    B1 = 16
    state1 = jax.random.normal(kx, (B1, INPUT_SIZE), jnp.float32)
    reward1 = jax.block_until_ready(reward_approximator_forward(state1, params))
    ref1 = _reference(state1, w1, b1, w2, b2)
    assert reward1.shape == (B1, 1)
    # bf16 MXU operands + f32 accumulation -> loosened tolerance vs pure-f32 ref.
    assert jnp.allclose(reward1, ref1, atol=2e-2, rtol=2e-2), "mismatch vs reference (B=16)"

    # Case 2: ragged batch -> 2 grid steps, partial (masked) last tile.
    B2 = 300
    state2 = jax.random.normal(kx2, (B2, INPUT_SIZE), jnp.float32)
    reward2 = jax.block_until_ready(reward_approximator_forward(state2, params))
    ref2 = _reference(state2, w1, b1, w2, b2)
    assert reward2.shape == (B2, 1)
    assert jnp.allclose(reward2, ref2, atol=2e-2, rtol=2e-2), "mismatch vs reference (B=300)"

    print("KERNEL_OK")
</pallas_src>

<mosaic_0001>
module attributes {stable_mosaic.version = 11 : i64} {
  func.func @reward_mlp_kernel(%arg0: i32, %arg1: memref<16x840xf32, #tpu.memory_space<vmem>>, %arg2: memref<840x256xbf16, #tpu.memory_space<vmem>>, %arg3: memref<1x256xf32, #tpu.memory_space<vmem>>, %arg4: memref<1x256xf32, #tpu.memory_space<vmem>>, %arg5: memref<1x1xf32, #tpu.memory_space<smem>>, %arg6: memref<1x16xf32, #tpu.memory_space<vmem>>) attributes {dimension_semantics = [#tpu.dimension_semantics<parallel>], iteration_bounds = array<i64: 1>, scalar_prefetch = 0 : i64, scratch_operands = 0 : i64, tpu.core_type = #tpu.core_type<tc>, window_params = [{transform_indices = @transform_0, window_bounds = array<i64: 16, 840>}, {pipeline_mode = #tpu.pipeline_mode<synchronous>, transform_indices = @transform_1, window_bounds = array<i64: 840, 256>}, {pipeline_mode = #tpu.pipeline_mode<synchronous>, transform_indices = @transform_2, window_bounds = array<i64: 1, 256>}, {pipeline_mode = #tpu.pipeline_mode<synchronous>, transform_indices = @transform_3, window_bounds = array<i64: 1, 256>}, {transform_indices = @transform_4, window_bounds = array<i64: 1, 1>}, {transform_indices = @transform_5, window_bounds = array<i64: 1, 16>}]} {
    %c0 = arith.constant 0 : index
    %c0_0 = arith.constant 0 : index
    %0 = vector.load %arg1[%c0, %c0_0] : memref<16x840xf32, #tpu.memory_space<vmem>>, vector<16x840xf32>
    %1 = arith.truncf %0 : vector<16x840xf32> to vector<16x840xbf16>
    %c0_1 = arith.constant 0 : index
    %c0_2 = arith.constant 0 : index
    %2 = vector.load %arg2[%c0_1, %c0_2] : memref<840x256xbf16, #tpu.memory_space<vmem>>, vector<840x256xbf16>
    %cst = arith.constant dense<0.000000e+00> : vector<16x256xf32>
    %3 = tpu.matmul %1, %2, %cst {dimension_numbers = #tpu.dot_dimension_numbers<[1], [0], [0], [1], [0, 0, 1, 1], [], []>} : vector<16x840xbf16>, vector<840x256xbf16>, vector<16x256xf32> -> vector<16x256xf32>
    %c0_3 = arith.constant 0 : index
    %c0_4 = arith.constant 0 : index
    %4 = vector.load %arg3[%c0_3, %c0_4] : memref<1x256xf32, #tpu.memory_space<vmem>>, vector<1x256xf32>
    %5 = vector.broadcast %4 : vector<1x256xf32> to vector<16x256xf32>
    %6 = arith.addf %3, %5 : vector<16x256xf32>
    %cst_5 = arith.constant 0.000000e+00 : f32
    %7 = vector.broadcast %cst_5 : f32 to vector<16x256xf32>
    %8 = arith.maximumf %6, %7 : vector<16x256xf32>
    %c0_6 = arith.constant 0 : index
    %c0_7 = arith.constant 0 : index
    %9 = vector.load %arg4[%c0_6, %c0_7] : memref<1x256xf32, #tpu.memory_space<vmem>>, vector<1x256xf32>
    %10 = vector.broadcast %9 : vector<1x256xf32> to vector<16x256xf32>
    %11 = arith.mulf %8, %10 : vector<16x256xf32>
    %cst_8 = arith.constant dense<0.000000e+00> : vector<16xf32>
    %12 = vector.multi_reduction <add>, %11, %cst_8 [1] : vector<16x256xf32> to vector<16xf32>
    %c0_9 = arith.constant 0 : index
    %c0_10 = arith.constant 0 : index
    %13 = memref.load %arg5[%c0_9, %c0_10] : memref<1x1xf32, #tpu.memory_space<smem>>
    %14 = vector.broadcast %13 : f32 to vector<16xf32>
    %15 = arith.addf %12, %14 : vector<16xf32>
    %16 = vector.shape_cast %15 : vector<16xf32> to vector<1x16xf32>
    %c0_11 = arith.constant 0 : index
    %c0_12 = arith.constant 0 : index
    %17 = vector.load %arg6[%c0_11, %c0_12] : memref<1x16xf32, #tpu.memory_space<vmem>>, vector<1x16xf32>
    tpu.vector_store %arg6[%c0_11, %c0_12], %16 {strides = array<i32>} : memref<1x16xf32, #tpu.memory_space<vmem>>, vector<1x16xf32>,
    return
  }
  func.func @transform_0(%arg0: i32) -> (i32, i32) {
    %c0_i32 = arith.constant 0 : i32
    %c0_i32_0 = arith.constant 0 : i32
    return %arg0, %c0_i32 : i32, i32
  }
  func.func @transform_1(%arg0: i32) -> (i32, i32) {
    %c0_i32 = arith.constant 0 : i32
    %c0_i32_0 = arith.constant 0 : i32
    %c0_i32_1 = arith.constant 0 : i32
    return %c0_i32, %c0_i32_0 : i32, i32
  }
  func.func @transform_2(%arg0: i32) -> (i32, i32) {
    %c0_i32 = arith.constant 0 : i32
    %c0_i32_0 = arith.constant 0 : i32
    %c0_i32_1 = arith.constant 0 : i32
    return %c0_i32, %c0_i32_0 : i32, i32
  }
  func.func @transform_3(%arg0: i32) -> (i32, i32) {
    %c0_i32 = arith.constant 0 : i32
    %c0_i32_0 = arith.constant 0 : i32
    %c0_i32_1 = arith.constant 0 : i32
    return %c0_i32, %c0_i32_0 : i32, i32
  }
  func.func @transform_4(%arg0: i32) -> (i32, i32) {
    %c0_i32 = arith.constant 0 : i32
    %c0_i32_0 = arith.constant 0 : i32
    %c0_i32_1 = arith.constant 0 : i32
    return %c0_i32, %c0_i32_0 : i32, i32
  }
  func.func @transform_5(%arg0: i32) -> (i32, i32) {
    %c0_i32 = arith.constant 0 : i32
    %c0_i32_0 = arith.constant 0 : i32
    return %c0_i32, %arg0 : i32, i32
  }
}

</mosaic_0001>

<bundles_post_ra>
// kernel: tpu_custom_call.1
= control target key start
LH: loop header
LB: loop body
LE: loop exit
PB: predicated region body
PF: predicated region fallthrough
CT: control target
= control target key end

     0   :  { %11 = vsyncpa [#allocation4], 0  ;;  %s1406_s0 = inlined_call_operand.hbm [shape: f32[16,840], index: 0, kind: input, shape index: {}]   ;;  %s1407_s1 = inlined_call_operand.hbm [shape: bf16[840,256], index: 1, kind: input, shape index: {}]   ;;  %s1408_s2 = inlined_call_operand.vmem [shape: f32[1,256], index: 2, kind: input, shape index: {}]   ;;  %s1409_s3 = inlined_call_operand.vmem [shape: f32[1,256], index: 3, kind: input, shape index: {}]   ;;  %s1410_s4 = inlined_call_operand.<no memory space> [shape: f32[1,1], index: 4, kind: input, shape index: {}]   ;;  %s1411_s5 = inlined_call_operand.hbm [shape: f32[1,16], index: 5, kind: output, shape index: {}]  }
   0x1   :  { %12 = vsyncpa [#allocation7], 0 }
   0x2   :  { %13 = vsyncpa [#allocation5], 0  ;;  %s1323_s18 = smov [#allocation3]   ;;  %s1251_s22 = scalar_lea.hbm %s1406_s0, 1792 }
   0x3   :  { %s19_s19 = sshll.u32 %s1323_s18, 4  ;;  %p1252_p0 = scmp.ne.s32.totalorder %s1406_s0, %s1251_s22  ;;  %s20_s19 = int_to_ptr.vmem [resolvable:$true] %s19_s19 }
   0x4   :  { %p1255_p1 = scmp.lt.u32.totalorder %s1251_s22, %s1406_s0 }
   0x6   :  { %p1257_p2 = pnand %p1255_p1, %p1252_p0 }
   0x8   :  { %1260 = shalt.err (!%p1257_p2)
}
   0x9   :  { %s1261_s27 = scalar_lea.vmem %s20_s19, 1792  ;;  %p1266_p4 = scmp.lt.s32.totalorder %s20_s19, %s20_s19 }
   0xa   :  { %p1262_p3 = scmp.ne.s32.totalorder %s20_s19, %s1261_s27  ;;  %p1267_p5 = scmp.lt.s32.totalorder %s1261_s27, %s1261_s27 }
   0xc   :  { %p1268_p6 = por %p1267_p5, %p1266_p4 }
   0xe   :  { %p1269_p7 = pnand %p1268_p6, %p1262_p3 }
  0x10   :  { %1272 = shalt.err (!%p1269_p7)
}
  0x11   :  { %s1324_s28 = smov 896   ;;  %s1325_s29 = smov 56  }
  0x12   :  { %25 = dma.hbm_to_vmem [thread:$0]  %s1406_s0, 1792, %s20_s19, [#allocation4], %s1324_s28, %s1324_s28, %s1325_s29  }
  0x13   :  { %s1326_s7 = smov [#allocation6]   ;;  %s1273_s11 = scalar_lea.hbm %s1407_s1, 13440 }
  0x14   :  { %s31_s8 = sshll.u32 %s1326_s7, 4  ;;  %p1274_p8 = scmp.ne.s32.totalorder %s1407_s1, %s1273_s11  ;;  %s32_s8 = int_to_ptr.vmem [resolvable:$true] %s31_s8 }
  0x15   :  { %p1277_p9 = scmp.lt.u32.totalorder %s1273_s11, %s1407_s1 }
  0x17   :  { %p1279_p10 = pnand %p1277_p9, %p1274_p8 }
  0x19   :  { %1282 = shalt.err (!%p1279_p10)
}
  0x1a   :  { %s1283_s16 = scalar_lea.vmem %s32_s8, 13440  ;;  %p1288_p12 = scmp.lt.s32.totalorder %s32_s8, %s32_s8 }
  0x1b   :  { %p1284_p11 = scmp.ne.s32.totalorder %s32_s8, %s1283_s16  ;;  %p1289_p13 = scmp.lt.s32.totalorder %s1283_s16, %s1283_s16 }
  0x1d   :  { %p1290_p0 = por %p1289_p13, %p1288_p12 }
  0x1f   :  { %p1291_p1 = pnand %p1290_p0, %p1284_p11 }
  0x21   :  { %1294 = shalt.err (!%p1291_p1)
}
  0x22   :  { %s1327_s0 = smov 128   ;;  %s1328_s17 = smov 8  }
  0x23   :  { %37 = dma.hbm_to_vmem [thread:$0]  %s1407_s1, 13440, %s32_s8, [#allocation7], %s1327_s0, %s1327_s0, %s1328_s17  }
  0x24   :  { %1317 = dma.done.wait [#allocation4], 1792  }
  0x25   :  { %1318 = vsyncadd [#allocation4], 4294965504 }
  0x26   :  { %1319 = dma.done.wait [#allocation7], 13440  }
  0x27   :  { %1320 = vsyncadd [#allocation7], 4294953856  ;;  %v1093_v0 = vld [vmem:[#allocation6 + $0x4] ss:$8 sps:$4 sm:$0xff]   ;;  %v1095_v1 = vld [vmem:[#allocation6] ss:$8 sps:$4 sm:$0xff]  }
  0x28   :  { %725 = vmatprep.subr.bf16.mxu1 %v1093_v0  ;;  %v1096_v2 = vld [vmem:[#allocation6 + $0x14] ss:$8 sps:$4 sm:$0xff]   ;;  %v1098_v3 = vld [vmem:[#allocation6 + $0x10] ss:$8 sps:$4 sm:$0xff]   ;;  %v1099_v4 = vld [vmem:[#allocation6 + $0x24] ss:$8 sps:$4 sm:$0xff]  }
  0x29   :  { %726 = vmatpush1.bf16.msra.mxu1 %v1095_v1  ;;  %v1101_v5 = vld [vmem:[#allocation6 + $0x20] ss:$8 sps:$4 sm:$0xff]   ;;  %v1102_v6 = vld [vmem:[#allocation6 + $0x34] ss:$8 sps:$4 sm:$0xff]   ;;  %v1113_v7 = vld [vmem:[#allocation6 + $0x204] ss:$8 sps:$4 sm:$0xff]  }
  0x2a   :  { %727 = vmatprep.subr.bf16.mxu1 %v1096_v2  ;;  %v1116_v8 = vld [vmem:[#allocation6 + $0x200] ss:$8 sps:$4 sm:$0xff]   ;;  %v1104_v9 = vld [vmem:[#allocation6 + $0x30] ss:$8 sps:$4 sm:$0xff]   ;;  %811 = vmatprep.subr.bf16.mxu0 %v1113_v7  ;;  %v1105_v10 = vld [vmem:[#allocation6 + $0x44] ss:$8 sps:$4 sm:$0xff]  }
  0x2b   :  { %812 = vmatpush1.bf16.msra.mxu0 %v1116_v8  ;;  %v1119_v11 = vld [vmem:[#allocation6 + $0x214] ss:$8 sps:$4 sm:$0xff]   ;;  %v1122_v12 = vld [vmem:[#allocation6 + $0x210] ss:$8 sps:$4 sm:$0xff]   ;;  %v1107_v13 = vld [vmem:[#allocation6 + $0x40] ss:$8 sps:$4 sm:$0xff]  }
  0x2c   :  { %813 = vmatprep.subr.bf16.mxu0 %v1119_v11  ;;  %v1108_v14 = vld [vmem:[#allocation6 + $0x54] ss:$8 sps:$4 sm:$0xff]   ;;  %v1125_v15 = vld [vmem:[#allocation6 + $0x224] ss:$8 sps:$4 sm:$0xff]   ;;  %v1128_v16 = vld [vmem:[#allocation6 + $0x220] ss:$8 sps:$4 sm:$0xff]  }
  0x2d   :  { %728 = vmatpush1.bf16.msra.mxu1 %v1098_v3  ;;  %v1131_v17 = vld [vmem:[#allocation6 + $0x234] ss:$8 sps:$4 sm:$0xff]   ;;  %v1110_v18 = vld [vmem:[#allocation6 + $0x50] ss:$8 sps:$4 sm:$0xff]   ;;  %v1111_v19 = vld [vmem:[#allocation6 + $0x64] ss:$8 sps:$4 sm:$0xff]  }
  0x2e   :  { %729 = vmatprep.subr.bf16.mxu1 %v1099_v4  ;;  %v1134_v20 = vld [vmem:[#allocation6 + $0x230] ss:$8 sps:$4 sm:$0xff]   ;;  %v1137_v21 = vld [vmem:[#allocation6 + $0x244] ss:$8 sps:$4 sm:$0xff]   ;;  %v1115_v22 = vld [vmem:[#allocation6 + $0x60] ss:$8 sps:$4 sm:$0xff]  }
  0x2f   :  { %814 = vmatpush1.bf16.msra.mxu0 %v1122_v12  ;;  %v1117_v23 = vld [vmem:[#allocation6 + $0x74] ss:$8 sps:$4 sm:$0xff]   ;;  %v1140_v24 = vld [vmem:[#allocation6 + $0x240] ss:$8 sps:$4 sm:$0xff]   ;;  %v1121_v26 = vld [vmem:[#allocation6 + $0x70] ss:$8 sps:$4 sm:$0xff]  }
  0x30   :  { %815 = vmatprep.subr.bf16.mxu0 %v1125_v15  ;;  %v1143_v25 = vld [vmem:[#allocation6 + $0x254] ss:$8 sps:$4 sm:$0xff]   ;;  %v1123_v27 = vld [vmem:[#allocation6 + $0x84] ss:$8 sps:$4 sm:$0xff]   ;;  %v1146_v28 = vld [vmem:[#allocation6 + $0x250] ss:$8 sps:$4 sm:$0xff]  }
  0x31   :  { %730 = vmatpush1.bf16.msra.mxu1 %v1101_v5  ;;  %v1149_v29 = vld [vmem:[#allocation6 + $0x264] ss:$8 sps:$4 sm:$0xff]   ;;  %v1127_v30 = vld [vmem:[#allocation6 + $0x80] ss:$8 sps:$4 sm:$0xff]   ;;  %v1129_v31 = vld [vmem:[#allocation6 + $0x94] ss:$8 sps:$4 sm:$0xff]  }
  0x32   :  { %731 = vmatprep.subr.bf16.mxu1 %v1102_v6  ;;  %v1152_v32 = vld [vmem:[#allocation6 + $0x260] ss:$8 sps:$4 sm:$0xff]   ;;  %v1155_v33 = vld [vmem:[#allocation6 + $0x274] ss:$8 sps:$4 sm:$0xff]   ;;  %v1133_v34 = vld [vmem:[#allocation6 + $0x90] ss:$8 sps:$4 sm:$0xff]  }
  0x33   :  { %816 = vmatpush1.bf16.msra.mxu0 %v1128_v16  ;;  %v52_v35 = vld [vmem:[#allocation3 + $0x8] sm:$0xff]  ;;  %v59_v36 = vld [vmem:[#allocation3 + $0x40] sm:$0xff]  ;;  %v1135_v37 = vld [vmem:[#allocation6 + $0xa4] ss:$8 sps:$4 sm:$0xff]   ;;  %vm718_vm0 = vcmask 1043456   ;;  %vm714_vm1 = vcmask 588800  }
  0x34   :  { %817 = vmatprep.subr.bf16.mxu0 %v1131_v17  ;;  %v1158_v38 = vld [vmem:[#allocation6 + $0x270] ss:$8 sps:$4 sm:$0xff]   ;;  %v66_v39 = vpack.c.bf16 %v59_v36, %v52_v35  ;;  %v1161_v40 = vld [vmem:[#allocation6 + $0x284] ss:$8 sps:$4 sm:$0xff]   ;;  %v1139_v41 = vld [vmem:[#allocation6 + $0xa0] ss:$8 sps:$4 sm:$0xff]  }
  0x35   :  { %732 = vmatpush1.bf16.msra.mxu1 %v1104_v9  ;;  %v1141_v42 = vld [vmem:[#allocation6 + $0xb4] ss:$8 sps:$4 sm:$0xff]   ;;  %v1164_v43 = vld [vmem:[#allocation6 + $0x280] ss:$8 sps:$4 sm:$0xff]   ;;  %v1145_v45 = vld [vmem:[#allocation6 + $0xb0] ss:$8 sps:$4 sm:$0xff]  }
  0x36   :  { %733 = vmatprep.subr.bf16.mxu1 %v1105_v10  ;;  %757 = vmatprep.mubr.bf16.mxu1 %v66_v39  ;;  %v1167_v44 = vld [vmem:[#allocation6 + $0x294] ss:$8 sps:$4 sm:$0xff]   ;;  %v1147_v46 = vld [vmem:[#allocation6 + $0xc4] ss:$8 sps:$4 sm:$0xff]   ;;  %v1170_v47 = vld [vmem:[#allocation6 + $0x290] ss:$8 sps:$4 sm:$0xff]  }
  0x37   :  { %818 = vmatpush1.bf16.msra.mxu0 %v1134_v20  ;;  %v1174_v48 = vld [vmem:[#allocation6 + $0x2a4] ss:$8 sps:$4 sm:$0xff]   ;;  %v1151_v49 = vld [vmem:[#allocation6 + $0xc0] ss:$8 sps:$4 sm:$0xff]   ;;  %v1153_v50 = vld [vmem:[#allocation6 + $0xd4] ss:$8 sps:$4 sm:$0xff]  }
  0x38   :  { %819 = vmatprep.subr.bf16.mxu0 %v1137_v21  ;;  %v1176_v51 = vld [vmem:[#allocation6 + $0x2a0] ss:$8 sps:$4 sm:$0xff]   ;;  %v1180_v52 = vld [vmem:[#allocation6 + $0x2b4] ss:$8 sps:$4 sm:$0xff]   ;;  %v1157_v53 = vld [vmem:[#allocation6 + $0xd0] ss:$8 sps:$4 sm:$0xff]  }
  0x39   :  { %734 = vmatpush1.bf16.msra.mxu1 %v1107_v13  ;;  %v1159_v54 = vld [vmem:[#allocation6 + $0xe4] ss:$8 sps:$4 sm:$0xff]   ;;  %v1182_v55 = vld [vmem:[#allocation6 + $0x2b0] ss:$8 sps:$4 sm:$0xff]   ;;  %v1163_v60 = vld [vmem:[#allocation6 + $0xe0] ss:$8 sps:$4 sm:$0xff]  }
  0x3a   :  { %735 = vmatprep.subr.bf16.mxu1 %v1108_v14  ;;  %v1186_v56 = vld [vmem:[#allocation6 + $0x2c4] ss:$8 sps:$4 sm:$0xff]   ;;  %v56_v57 = vld [vmem:[#allocation3 + $0x28] sm:$0xff]  ;;  %v63_v58 = vld [vmem:[#allocation3 + $0x60] sm:$0xff]  ;;  %s1330_s23 = smov [#allocation8]   ;;  %vm940_vm2 = vcmask 130112  }
  0x3b   :  { %820 = vmatpush1.bf16.msra.mxu0 %v1140_v24  ;;  %v70_v59 = vpack.c.bf16 %v63_v58, %v56_v57  ;;  %v1165_v61 = vld [vmem:[#allocation6 + $0xf4] ss:$8 sps:$4 sm:$0xff]   ;;  %v1188_v62 = vld [vmem:[#allocation6 + $0x2c0] ss:$8 sps:$4 sm:$0xff]   ;;  %v1169_v0 = vld [vmem:[#allocation6 + $0xf0] ss:$8 sps:$4 sm:$0xff]  }
  0x3c   :  { %821 = vmatprep.subr.bf16.mxu0 %v1143_v25  ;;  %v1192_v63 = vld [vmem:[#allocation6 + $0x2d4] ss:$8 sps:$4 sm:$0xff]   ;;  %v1173_v1 = vld [vmem:[#allocation6 + $0x104] ss:$8 sps:$4 sm:$0xff]   ;;  %v1194_v4 = vld [vmem:[#allocation6 + $0x2d0] ss:$8 sps:$4 sm:$0xff]  }
  0x3d   :  { %736 = vmatpush1.bf16.msra.mxu1 %v1110_v18  ;;  %843 = vmatprep.mubr.bf16.mxu0 %v70_v59  ;;  %v51_v2 = vld [vmem:[#allocation3] sm:$0xff]  ;;  %v58_v3 = vld [vmem:[#allocation3 + $0x38] sm:$0xff]  ;;  %s951_s24 = sshll.u32 %s1330_s23, 4  ;;  %vm943_vm3 = vcmask 122880   ;;  %s952_s24 = int_to_ptr.vmem [resolvable:$true] %s951_s24 }
  0x3e   :  { %737 = vmatprep.subr.bf16.mxu1 %v1111_v19  ;;  %v1198_v5 = vld [vmem:[#allocation6 + $0x2e4] ss:$8 sps:$4 sm:$0xff]   ;;  %v65_v6 = vpack.c.bf16 %v58_v3, %v51_v2  ;;  %v1171_v7 = vld [vmem:[#allocation6 + $0x100] ss:$8 sps:$4 sm:$0xff]   ;;  %v1179_v8 = vld [vmem:[#allocation6 + $0x114] ss:$8 sps:$4 sm:$0xff]   ;;  %p1300_p3 = scmp.lt.s32.totalorder %s952_s24, %s952_s24 }
  0x3f   :  { %822 = vmatpush1.bf16.msra.mxu0 %v1146_v28  ;;  %v1200_v9 = vld [vmem:[#allocation6 + $0x2e0] ss:$8 sps:$4 sm:$0xff]   ;;  %v1204_v10 = vld [vmem:[#allocation6 + $0x2f4] ss:$8 sps:$4 sm:$0xff]   ;;  %v1177_v11 = vld [vmem:[#allocation6 + $0x110] ss:$8 sps:$4 sm:$0xff]  }
  0x40   :  { %823 = vmatprep.subr.bf16.mxu0 %v1149_v29  ;;  %v1185_v12 = vld [vmem:[#allocation6 + $0x124] ss:$8 sps:$4 sm:$0xff]   ;;  %v1206_v13 = vld [vmem:[#allocation6 + $0x2f0] ss:$8 sps:$4 sm:$0xff]   ;;  %v1183_v17 = vld [vmem:[#allocation6 + $0x120] ss:$8 sps:$4 sm:$0xff]  }
  0x41   :  { %738 = vmatpush1.bf16.msra.mxu1 %v1115_v22  ;;  %v55_v14 = vld [vmem:[#allocation3 + $0x20] sm:$0xff]  ;;  %v62_v15 = vld [vmem:[#allocation3 + $0x58] sm:$0xff]  ;;  %v1329_v29 = vmov 0   ;;  %s1295_s25 = scalar_lea.vmem %s952_s24, 16  ;;  %s1299_s26 = scalar_lea.vmem %s952_s24, 32 }
  0x42   :  { %739 = vmatprep.subr.bf16.mxu1 %v1117_v23  ;;  %v1212_v16 = vld [vmem:[#allocation6 + $0x304] ss:$8 sps:$4 sm:$0xff]   ;;  %v69_v18 = vpack.c.bf16 %v62_v15, %v55_v14  ;;  %v1191_v19 = vld [vmem:[#allocation6 + $0x134] ss:$8 sps:$4 sm:$0xff]   ;;  %v1210_v20 = vld [vmem:[#allocation6 + $0x300] ss:$8 sps:$4 sm:$0xff]   ;;  %p1296_p2 = scmp.ne.s32.totalorder %s952_s24, %s1295_s25  ;;  %p1301_p4 = scmp.lt.s32.totalorder %s1299_s26, %s1295_s25 }
  0x43   :  { %824 = vmatpush1.bf16.msra.mxu0 %v1152_v32  ;;  %v1218_v21 = vld [vmem:[#allocation6 + $0x314] ss:$8 sps:$4 sm:$0xff]   ;;  %v54_v22 = vld [vmem:[#allocation3 + $0x18] sm:$0xff]  ;;  %v61_v23 = vld [vmem:[#allocation3 + $0x50] sm:$0xff] }
  0x44   :  { %825 = vmatprep.subr.bf16.mxu0 %v1155_v33  ;;  %v68_v24 = vpack.c.bf16 %v61_v23, %v54_v22  ;;  %v1189_v25 = vld [vmem:[#allocation6 + $0x130] ss:$8 sps:$4 sm:$0xff]   ;;  %v1224_v28 = vld [vmem:[#allocation6 + $0x324] ss:$8 sps:$4 sm:$0xff]   ;;  %v1222_v32 = vld [vmem:[#allocation6 + $0x320] ss:$8 sps:$4 sm:$0xff]   ;;  %p1302_p5 = por %p1301_p4, %p1300_p3 }
  0x45   :  { %740 = vmatpush1.bf16.msra.mxu1 %v1121_v26  ;;  %v1197_v26 = vld [vmem:[#allocation6 + $0x144] ss:$8 sps:$4 sm:$0xff]   ;;  %v1230_v33 = vld [vmem:[#allocation6 + $0x334] ss:$8 sps:$4 sm:$0xff]   ;;  %v1201_v35 = vld [vmem:[#allocation6 + $0x150] ss:$8 sps:$4 sm:$0xff]  }
  0x46   :  { %741 = vmatprep.subr.bf16.mxu1 %v1123_v27  ;;  %v1216_v27 = vld [vmem:[#allocation6 + $0x310] ss:$8 sps:$4 sm:$0xff]   ;;  %v1209_v36 = vld [vmem:[#allocation6 + $0x164] ss:$8 sps:$4 sm:$0xff]   ;;  %v1244_v57 = vld [vmem:[#allocation6 + $0x1d4] ss:$8 sps:$4 sm:$0xff]   ;;  %p1303_p6 = pnand %p1302_p5, %p1296_p2 }
  0x47   :  { %826 = vmatpush1.bf16.msra.mxu0 %v1158_v38  ;;  %v1242_v58 = vld [vmem:[#allocation6 + $0x1d0] ss:$8 sps:$4 sm:$0xff]   ;;  %v1247_v59 = vld [vmem:[#allocation6 + $0x1e4] ss:$8 sps:$4 sm:$0xff]  }
  0x48   :  { %827 = vmatprep.subr.bf16.mxu0 %v1161_v40  ;;  %v1207_v40 = vld [vmem:[#allocation6 + $0x160] ss:$8 sps:$4 sm:$0xff]   ;;  %v901_v14 = vld [vmem:[%s1409_s3] sm:$0x3] }
  0x49   :  { %742 = vmatpush1.bf16.msra.mxu1 %v1127_v30  ;;  %v1195_v30 = vld [vmem:[#allocation6 + $0x140] ss:$8 sps:$4 sm:$0xff]  }
  0x4a   :  { %743 = vmatprep.subr.bf16.mxu1 %v1129_v31  ;;  %v1203_v31 = vld [vmem:[#allocation6 + $0x154] ss:$8 sps:$4 sm:$0xff]  }
  0x4b   :  { %828 = vmatpush1.bf16.msra.mxu0 %v1164_v43  ;;  %v64_v43 = vld [vmem:[#allocation3 + $0x68] sm:$0xff] }
  0x4c   :  { %829 = vmatprep.subr.bf16.mxu0 %v1167_v44 }
  0x4d   :  { %744 = vmatpush1.bf16.msra.mxu1 %v1133_v34  ;;  %v176_v34 = vld [vmem:[#allocation6 + $0x340] sm:$0xff] }
  0x4e   :  { %745 = vmatprep.subr.bf16.mxu1 %v1135_v37  ;;  %v1228_v37 = vld [vmem:[#allocation6 + $0x330] ss:$8 sps:$4 sm:$0xff]   ;;  %v1066_v38 = vcombine.high %v176_v34, %v176_v34  ;;  %v1065_v39 = vcombine.low %v176_v34, %v176_v34 }
  0x4f   :  { %830 = vmatpush1.bf16.msra.mxu0 %v1170_v47  ;;  %v1221_v47 = vld [vmem:[#allocation6 + $0x184] ss:$8 sps:$4 sm:$0xff]  }
  0x50   :  { %831 = vmatprep.subr.bf16.mxu0 %v1174_v48  ;;  %v720_v44 = vsel %vm718_vm0, %v1065_v39, 0  ;;  %v1219_v48 = vld [vmem:[#allocation6 + $0x180] ss:$8 sps:$4 sm:$0xff]  }
  0x51   :  { %746 = vmatpush1.bf16.msra.mxu1 %v1139_v41  ;;  %v1215_v41 = vld [vmem:[#allocation6 + $0x174] ss:$8 sps:$4 sm:$0xff]  }
  0x52   :  { %747 = vmatprep.subr.bf16.mxu1 %v1141_v42  ;;  %v57_v42 = vld [vmem:[#allocation3 + $0x30] sm:$0xff] }
  0x53   :  { %832 = vmatpush1.bf16.msra.mxu0 %v1176_v51  ;;  %v1233_v51 = vld [vmem:[#allocation6 + $0x1a4] ss:$8 sps:$4 sm:$0xff]  }
  0x54   :  { %833 = vmatprep.subr.bf16.mxu0 %v1180_v52  ;;  %v1231_v52 = vld [vmem:[#allocation6 + $0x1a0] ss:$8 sps:$4 sm:$0xff]  }
  0x55   :  { %748 = vmatpush1.bf16.msra.mxu1 %v1145_v45  ;;  %v1213_v45 = vld [vmem:[#allocation6 + $0x170] ss:$8 sps:$4 sm:$0xff]  }
  0x56   :  { %749 = vmatprep.subr.bf16.mxu1 %v1147_v46  ;;  %v71_v46 = vpack.c.bf16 %v64_v43, %v57_v42 }
  0x57   :  { %834 = vmatpush1.bf16.msra.mxu0 %v1182_v55  ;;  %v1241_v55 = vld [vmem:[#allocation6 + $0x1c4] ss:$8 sps:$4 sm:$0xff]  }
  0x58   :  { %835 = vmatprep.subr.bf16.mxu0 %v1186_v56  ;;  %v1239_v56 = vld [vmem:[#allocation6 + $0x1c0] ss:$8 sps:$4 sm:$0xff]  }
  0x59   :  { %750 = vmatpush1.bf16.msra.mxu1 %v1151_v49  ;;  %v1227_v49 = vld [vmem:[#allocation6 + $0x194] ss:$8 sps:$4 sm:$0xff]  }
  0x5a   :  { %751 = vmatprep.subr.bf16.mxu1 %v1153_v50  ;;  %v1225_v50 = vld [vmem:[#allocation6 + $0x190] ss:$8 sps:$4 sm:$0xff]  }
  0x5b   :  { %836 = vmatpush1.bf16.msra.mxu0 %v1188_v62  ;;  %v1248_v62 = vld [vmem:[#allocation6 + $0x1f0] ss:$8 sps:$4 sm:$0xff]  }
  0x5c   :  { %837 = vmatprep.subr.bf16.mxu0 %v1192_v63  ;;  %v53_v63 = vld [vmem:[#allocation3 + $0x10] sm:$0xff] }
  0x5d   :  { %752 = vmatpush1.bf16.msra.mxu1 %v1157_v53  ;;  %v1238_v53 = vld [vmem:[#allocation6 + $0x1b4] ss:$8 sps:$4 sm:$0xff]  }
  0x5e   :  { %753 = vmatprep.subr.bf16.mxu1 %v1159_v54  ;;  %v1236_v54 = vld [vmem:[#allocation6 + $0x1b0] ss:$8 sps:$4 sm:$0xff]  }
  0x5f   :  { %838 = vmatpush1.bf16.msra.mxu0 %v1194_v4 }
  0x60   :  { %839 = vmatprep.subr.bf16.mxu0 %v1198_v5 }
  0x61   :  { %754 = vmatpush1.bf16.msra.mxu1 %v1163_v60  ;;  %v1245_v60 = vld [vmem:[#allocation6 + $0x1e0] ss:$8 sps:$4 sm:$0xff]  }
  0x62   :  { %755 = vmatprep.subr.bf16.mxu1 %v1165_v61  ;;  %v1250_v61 = vld [vmem:[#allocation6 + $0x1f4] ss:$8 sps:$4 sm:$0xff]  }
  0x63   :  { %840 = vmatpush1.bf16.msra.mxu0 %v1200_v9  ;;  %v177_v9 = vld [vmem:[%s1408_s2] sm:$0x3] }
  0x64   :  { %841 = vmatprep.subr.bf16.mxu0 %v1204_v10 }
  0x65   :  { %756 = vmatpush1.bf16.msra.mxu1 %v1169_v0  ;;  %v60_v0 = vld [vmem:[#allocation3 + $0x48] sm:$0xff] }
  0x66   :  { %768 = vmatprep.subr.bf16.mxu1 %v1173_v1  ;;  %v67_v1 = vpack.c.bf16 %v60_v0, %v53_v63 }
  0x67   :  { %842 = vmatpush1.bf16.msra.mxu0 %v1206_v13 }
  0x68   :  { %758 = vmatmul.mubr.bf16.vlgmr.msra.gmra.mrb[0].mxu1 %v65_v6  ;;  %854 = vmatprep.subr.bf16.mxu0 %v1212_v16  ;;  %v179_v6 = vlaneseq }
  0x69   :  { %769 = vmatpush1.bf16.msra.mxu1 %v1171_v7  ;;  %800 = vmatprep.mubr.bf16.mxu1 %v68_v24 }
  0x6a   :  { %770 = vmatprep.subr.bf16.mxu1 %v1179_v8  ;;  %844 = vmatmul.mubr.bf16.vlgmr.msra.gmra.mrb[0].mxu0 %v69_v18  ;;  %v180_v7 = vshrl.u32 %v179_v6, 7 }
  0x6b   :  { %855 = vmatpush1.bf16.msra.mxu0 %v1210_v20  ;;  %886 = vmatprep.mubr.bf16.mxu0 %v1329_v29 }
  0x6c   :  { %856 = vmatprep.subr.bf16.mxu0 %v1218_v21  ;;  %v181_v8 = vsub.s32 0, %v180_v7  ;;  %v185_v10 = vsub.s32 1, %v180_v7 }
  0x6d   :  { %771 = vmatpush1.bf16.msra.mxu1 %v1177_v11 }
  0x6e   :  { %772 = vmatprep.subr.bf16.mxu1 %v1185_v12  ;;  %v182_v11 = vrot.slane %v177_v9, %v181_v8  ;;  %v186_v12 = vrot.slane %v177_v9, %v185_v10  ;;  %v906_v22 = vrot.slane %v901_v14, %v181_v8 }
  0x6f   :  { %857 = vmatpush1.bf16.msra.mxu0 %v1216_v27 }
  0x70   :  { %858 = vmatprep.subr.bf16.mxu0 %v1224_v28 }
  0x71   :  { %773 = vmatpush1.bf16.msra.mxu1 %v1183_v17 }
  0x72   :  { %774 = vmatprep.subr.bf16.mxu1 %v1191_v19 }
  0x73   :  { %859 = vmatpush1.bf16.msra.mxu0 %v1222_v32 }
  0x74   :  { %860 = vmatprep.subr.bf16.mxu0 %v1230_v33 }
  0x75   :  { %775 = vmatpush1.bf16.msra.mxu1 %v1189_v25  ;;  %v910_v25 = vrot.slane %v901_v14, %v185_v10 }
  0x76   :  { %776 = vmatprep.subr.bf16.mxu1 %v1197_v26 }
  0x77   :  { %861 = vmatpush1.bf16.msra.mxu0 %v1228_v37 }
  0x78   :  { %1067 = vmatprep.subr.msk.bf16.mxu0 %vm718_vm0, %v1066_v38  ;;  %v930_v38 = vand.u32 127, %v179_v6 }
  0x79   :  { %777 = vmatpush1.bf16.msra.mxu1 %v1195_v30 }
  0x7a   :  { %778 = vmatprep.subr.bf16.mxu1 %v1203_v31  ;;  %v935_v39 = vadd.s32 4294967288, %v930_v38  ;;  %v933_v42 = vsub.s32 %v930_v38, %v180_v7 }
  0x7b   :  { %863 = vmatpush1.bf16.msra.mxu0 %v720_v44 }
  0x7c   :  { %v938_v44 = vsub.s32 %v935_v39, %v180_v7 }
  0x7d   :  { %779 = vmatpush1.bf16.msra.mxu1 %v1201_v35 }
  0x7e   :  { %780 = vmatprep.subr.bf16.mxu1 %v1209_v36  ;;  %1068 = vmatmul.mubr.msk.bf16.vlgmr.msra.gmra.mrb[0].mxu0 %vm714_vm1, %v71_v46 }
  0x81   :  { %781 = vmatpush1.bf16.msra.mxu1 %v1207_v40  ;;  %v924_v40 = vstv %s1410_s4 }
  0x82   :  { %782 = vmatprep.subr.bf16.mxu1 %v1215_v41 }
  0x85   :  { %783 = vmatpush1.bf16.msra.mxu1 %v1213_v45 }
  0x86   :  { %784 = vmatprep.subr.bf16.mxu1 %v1221_v47 }
  0x89   :  { %785 = vmatpush1.bf16.msra.mxu1 %v1219_v48 }
  0x8a   :  { %786 = vmatprep.subr.bf16.mxu1 %v1227_v49 }
  0x8d   :  { %787 = vmatpush1.bf16.msra.mxu1 %v1225_v50 }
  0x8e   :  { %788 = vmatprep.subr.bf16.mxu1 %v1233_v51 }
  0x91   :  { %789 = vmatpush1.bf16.msra.mxu1 %v1231_v52 }
  0x92   :  { %790 = vmatprep.subr.bf16.mxu1 %v1238_v53 }
  0x95   :  { %791 = vmatpush1.bf16.msra.mxu1 %v1236_v54 }
  0x96   :  { %792 = vmatprep.subr.bf16.mxu1 %v1241_v55 }
  0x99   :  { %793 = vmatpush1.bf16.msra.mxu1 %v1239_v56 }
  0x9a   :  { %794 = vmatprep.subr.bf16.mxu1 %v1244_v57 }
  0x9d   :  { %795 = vmatpush1.bf16.msra.mxu1 %v1242_v58 }
  0x9e   :  { %796 = vmatprep.subr.bf16.mxu1 %v1247_v59 }
  0xa1   :  { %797 = vmatpush1.bf16.msra.mxu1 %v1245_v60 }
  0xa2   :  { %798 = vmatprep.subr.bf16.mxu1 %v1250_v61 }
  0xa5   :  { %799 = vmatpush1.bf16.msra.mxu1 %v1248_v62 }
  0xa8   :  { %801 = vmatmul.mubr.bf16.vlgmr.msra.gmra.mrb[0].mxu1 %v67_v1 }
 0x151   :  { %v888_v2 = vpop.f32.mrb[0].mxu0 }
 0x152   :  { %v890_v3 = vpop.f32.mrb[1].mxu0 }
 0x153   :  { %v892_v4 = vpop.f32.mrb[2].mxu0 }
 0x154   :  { %v894_v5 = vpop.f32.mrb[3].mxu0 }
 0x17b   :  { %v802_v13 = vpop.f32.mrb[0].mxu1 }
 0x17c   :  { %v1069_v15 = vadd.f32 %v802_v13, %v182_v11  ;;  %v804_v16 = vpop.f32.mrb[1].mxu1 }
 0x17d   :  { %v1071_v17 = vadd.f32 %v804_v16, %v186_v12  ;;  %v806_v18 = vpop.f32.mrb[2].mxu1 }
 0x17e   :  { %v1070_v19 = vadd.f32 %v1069_v15, %v888_v2  ;;  %v1073_v20 = vadd.f32 %v806_v18, %v182_v11  ;;  %v808_v21 = vpop.f32.mrb[3].mxu1 }
 0x17f   :  { %v1072_v23 = vadd.f32 %v1071_v17, %v890_v3  ;;  %v1075_v24 = vadd.f32 %v808_v21, %v186_v12 }
 0x180   :  { %v897_v26 = vmax.f32 %v1070_v19, 0.0  ;;  %v1074_v27 = vadd.f32 %v1073_v20, %v892_v4 }
 0x181   :  { %v898_v28 = vmax.f32 %v1072_v23, 0.0  ;;  %v1076_v29 = vadd.f32 %v1075_v24, %v894_v5 }
 0x182   :  { %v899_v30 = vmax.f32 %v1074_v27, 0.0  ;;  %v913_v31 = vmul.f32 %v906_v22, %v897_v26 }
 0x183   :  { %v900_v32 = vmax.f32 %v1076_v29, 0.0  ;;  %v914_v33 = vmul.f32 %v910_v25, %v898_v28 }
 0x184   :  { %v915_v34 = vmul.f32 %v906_v22, %v899_v30 }
 0x185   :  { %v917_v35 = vadd.f32 %v914_v33, %v913_v31  ;;  %v916_v36 = vmul.f32 %v910_v25, %v900_v32 }
 0x187   :  { %918 = vadd.xlane.f32.xlu0 %v917_v35  ;;  %v920_v37 = vadd.f32 %v916_v36, %v915_v34 }
 0x18b   :  { %921 = vadd.xlane.f32.xlu0 %v920_v37 }
 0x214   :  { %v919_v41 = vpop.xlane.xlu0 %918 }
 0x215   :  { %v925_v43 = vadd.f32 %v924_v40, %v919_v41 }
 0x217   :  { %v934_v47 = vrot.slane %v925_v43, %v933_v42 }
 0x218   :  { %v922_v45 = vpop.xlane.xlu0 %921 }
 0x219   :  { %v926_v46 = vadd.f32 %v924_v40, %v922_v45 }
 0x21b   :  { %v939_v48 = vrot.slane %v926_v46, %v938_v44 }
 0x21d   :  { %v941_v49 = vsel %vm940_vm2, %v939_v48, %v934_v47 }
 0x21e   :  { %944 = vst.msk [vmem:[#allocation8] sm:$0x1] %vm943_vm3, %v941_v49 }
 0x21f   :  { %1306 = shalt.err (!%p1303_p6)
}
 0x220   :  { %s1307_s28 = scalar_lea.hbm %s1411_s5, 16 }
 0x221   :  { %p1308_p7 = scmp.ne.s32.totalorder %s1411_s5, %s1307_s28  ;;  %p1311_p8 = scmp.lt.u32.totalorder %s1307_s28, %s1411_s5 }
 0x223   :  { %p1313_p9 = pnand %p1311_p8, %p1308_p7 }
 0x225   :  { %1316 = shalt.err (!%p1313_p9)
}
 0x226   :  { %954 = dma.vmem_to_hbm [thread:$0]  %s952_s24, 16, %s1411_s5, [#allocation5]  }
 0x227   :  { %1321 = dma.done.wait [#allocation5], 16  }
 0x228   :  { %1322 = vsyncadd [#allocation5], 4294967280 }
 0x229   :  { %958 = vsyncpa [#allocation4], 1 }
 0x22a   :  { %959 = vsyncpa [#allocation7], 1 }
 0x22b   :  { %960 = vsyncpa [#allocation5], 1 }

</bundles_post_ra>
